<compile_context>
chip_gen: v6e
topology: v6e:2x2x1
jax: 0.10.0
libtpu: 0.0.40
codegen_flags: <defaults>
</compile_context>

<pallas_src>
import functools

import jax
import jax.numpy as jnp
from jax.experimental import pallas as pl
from jax.experimental.pallas import tpu as pltpu


def _round_up(x, m):
    return ((x + m - 1) // m) * m


def _vmem_capacity_bytes():
    """Physical VMEM per TensorCore; falls back to the smallest generation (v7x: 64 MiB)."""
    try:
        cap = getattr(pltpu.get_tpu_info(), "vmem_capacity_bytes", None)
        if cap:
            return int(cap)
    except Exception:
        pass
    return 64 << 20


# --------------------------------------------------------------------------- #
# Kernels
# --------------------------------------------------------------------------- #
def _autorec_resident_kernel(x_ref, w1t_ref, b1_ref, w2t_ref, b2_ref, o_ref):
    # Path A: both weight matrices resident in VMEM; one batch tile per grid step.
    x = x_ref[...].astype(w1t_ref.dtype)          # VPU cast, hides under the MXU
    pre1 = jnp.dot(x, w1t_ref[...], preferred_element_type=jnp.float32) + b1_ref[...]
    h = jax.nn.sigmoid(pre1)                      # EUP slot -> effectively free
    out = jnp.dot(h.astype(w2t_ref.dtype), w2t_ref[...],
                  preferred_element_type=jnp.float32) + b2_ref[...]
    o_ref[...] = out.astype(o_ref.dtype)


def _autorec_ntiled_kernel(x_ref, w1t_ref, b1_ref, w2t_ref, b2_ref, o_ref, h_ref):
    # Path B: encoder once per batch tile (inner grid index j == 0) into VMEM scratch h;
    # decoder streams W2 / b2 / out in N-tiles of block_n columns.
    @pl.when(pl.program_id(1) == 0)
    def _():
        x = x_ref[...].astype(w1t_ref.dtype)
        pre1 = jnp.dot(x, w1t_ref[...], preferred_element_type=jnp.float32) + b1_ref[...]
        h_ref[...] = jax.nn.sigmoid(pre1).astype(h_ref.dtype)

    out = jnp.dot(h_ref[...], w2t_ref[...],
                  preferred_element_type=jnp.float32) + b2_ref[...]
    o_ref[...] = out.astype(o_ref.dtype)


# --------------------------------------------------------------------------- #
# Parameter prep (one-time, outside the hot path)
# --------------------------------------------------------------------------- #
def prepare_autorec_params(w1, b1, w2, b2, param_dtype=jnp.bfloat16):
    """Transpose + cast + lane-pad the PyTorch-layout parameters ONCE.

    In  (PyTorch Linear): w1 [hidden, num_items], b1 [hidden],
                          w2 [num_items, hidden], b2 [num_items]
    Out: w1t [num_items, hidden_p], b1 [1, hidden_p],
         w2t [hidden_p, num_items], b2 [1, num_items]   (hidden_p = hidden rounded to 128)
    Padded hidden units are exact no-ops: their W2 rows are zero, so the sigmoid(0)=0.5
    they produce never reaches the output.
    """
    # TODO(synk): optionally also pad num_items to a multiple of 128 (lane-dense output
    # stores / clean MXU K); that requires a matching per-call pad of x and slice of out,
    # so it is left to the caller when the catalog size is far from a 128 multiple.
    hidden, num_items = w1.shape
    hidden_p = _round_up(hidden, 128)
    pad_h = hidden_p - hidden

    w1t = jnp.asarray(w1).T.astype(param_dtype)          # [num_items, hidden]
    w2t = jnp.asarray(w2).T.astype(param_dtype)          # [hidden, num_items]
    b1v = jnp.asarray(b1).astype(jnp.float32)
    if pad_h:
        w1t = jnp.pad(w1t, ((0, 0), (0, pad_h)))
        w2t = jnp.pad(w2t, ((0, pad_h), (0, 0)))         # zero rows -> padded units add 0
        b1v = jnp.pad(b1v, ((0, pad_h),))
    b1_2d = b1v.reshape(1, hidden_p)
    b2_2d = jnp.asarray(b2).astype(jnp.float32).reshape(1, num_items)
    return w1t, b1_2d, w2t, b2_2d


# --------------------------------------------------------------------------- #
# Forward
# --------------------------------------------------------------------------- #
@functools.partial(
    jax.jit, static_argnames=("block_batch", "block_n", "out_dtype", "force_tiled"))
def autorec_forward(x, w1t, b1_2d, w2t, b2_2d, *,
                    block_batch=128, block_n=2048, out_dtype=None, force_tiled=False):
    """Fused AutoRec forward.

    x     : [B, num_items]      (any float dtype; cast to the weight dtype in-kernel)
    w1t   : [num_items, hidden_p]
    b1_2d : [1, hidden_p]
    w2t   : [hidden_p, num_items]
    b2_2d : [1, num_items]
    Returns [B, num_items] in `out_dtype` (default: x.dtype).
    """
    B, num_items = x.shape
    hidden_p = w1t.shape[1]
    w_dtype = w1t.dtype
    w_isize = jnp.dtype(w_dtype).itemsize
    x_isize = jnp.dtype(x.dtype).itemsize
    out_dtype = x.dtype if out_dtype is None else jnp.dtype(out_dtype)
    out_isize = jnp.dtype(out_dtype).itemsize

    # Batch tile: no wrapper pad / slice -- Pallas clips the partial last block.
    tb = min(block_batch, _round_up(B, 8))
    if pl.cdiv(B, tb) == 1 and B > 8:
        # Ensure >= 2 batch blocks so both v7x TensorCores get work.
        tb = max(8, _round_up(pl.cdiv(B, 2), 8))
    n_blocks = pl.cdiv(B, tb)

    vmem_budget = _vmem_capacity_bytes() - (4 << 20)     # headroom below physical
    slack = 6 << 20                                      # internal scratch / semaphores

    weight_bytes = 2 * num_items * hidden_p * w_isize
    bias_bytes = (hidden_p + num_items) * 4
    x_tiles = 2 * tb * num_items * x_isize               # double-buffered x tiles
    out_tiles = 2 * tb * num_items * out_isize           # double-buffered out tiles
    need_resident = weight_bytes + bias_bytes + x_tiles + out_tiles + slack

    flops = 4 * B * num_items * hidden_p
    transc = B * hidden_p

    if not force_tiled and need_resident <= vmem_budget:
        # -------- Path A: both weights resident, 1-D batch-parallel grid -------- #
        vmem_limit = int(min(max(need_resident, 32 << 20), vmem_budget))
        cost = pl.CostEstimate(
            flops=flops, transcendentals=transc,
            bytes_accessed=weight_bytes + bias_bytes
                           + B * num_items * (x_isize + out_isize))
        return pl.pallas_call(
            _autorec_resident_kernel,
            out_shape=jax.ShapeDtypeStruct((B, num_items), out_dtype),
            grid_spec=pltpu.PrefetchScalarGridSpec(
                num_scalar_prefetch=0,
                grid=(n_blocks,),
                in_specs=[
                    pl.BlockSpec((tb, num_items), lambda i: (i, 0)),
                    # Grid-invariant weights / biases: single-buffered, fetched once.
                    pl.BlockSpec((num_items, hidden_p), lambda i: (0, 0),
                                 pipeline_mode=pl.Buffered(1)),
                    pl.BlockSpec((1, hidden_p), lambda i: (0, 0),
                                 pipeline_mode=pl.Buffered(1)),
                    pl.BlockSpec((hidden_p, num_items), lambda i: (0, 0),
                                 pipeline_mode=pl.Buffered(1)),
                    pl.BlockSpec((1, num_items), lambda i: (0, 0),
                                 pipeline_mode=pl.Buffered(1)),
                ],
                out_specs=pl.BlockSpec((tb, num_items), lambda i: (i, 0)),
            ),
            compiler_params=pltpu.CompilerParams(
                dimension_semantics=("parallel",),
                vmem_limit_bytes=vmem_limit),
            cost_estimate=cost,
        )(x, w1t, b1_2d, w2t, b2_2d)

    # -------- Path B: decoder N-tiled (large catalogs / v7x 64 MiB VMEM) -------- #
    bn = min(_round_up(block_n, 128), _round_up(num_items, 128))
    n_ntiles = pl.cdiv(num_items, bn)
    need_tiled = (num_items * hidden_p * w_isize + hidden_p * 4      # resident W1t + b1
                  + x_tiles
                  + 2 * hidden_p * bn * w_isize + 2 * bn * 4         # streamed W2t / b2 tiles
                  + 2 * tb * bn * out_isize                          # out tiles
                  + tb * hidden_p * w_isize                          # h scratch
                  + slack)
    vmem_limit = int(min(max(need_tiled, 32 << 20), vmem_budget))
    cost = pl.CostEstimate(
        flops=flops, transcendentals=transc,
        bytes_accessed=num_items * hidden_p * w_isize                # W1t once
                       + n_blocks * num_items * hidden_p * w_isize   # W2t per batch block
                       + bias_bytes
                       + B * num_items * (x_isize + out_isize))
    return pl.pallas_call(
        _autorec_ntiled_kernel,
        out_shape=jax.ShapeDtypeStruct((B, num_items), out_dtype),
        grid_spec=pltpu.PrefetchScalarGridSpec(
            num_scalar_prefetch=0,
            grid=(n_blocks, n_ntiles),
            in_specs=[
                # x block depends only on i -> fetched once per batch tile, held across j.
                pl.BlockSpec((tb, num_items), lambda i, j: (i, 0)),
                pl.BlockSpec((num_items, hidden_p), lambda i, j: (0, 0),
                             pipeline_mode=pl.Buffered(1)),
                pl.BlockSpec((1, hidden_p), lambda i, j: (0, 0),
                             pipeline_mode=pl.Buffered(1)),
                pl.BlockSpec((hidden_p, bn), lambda i, j: (0, j)),
                pl.BlockSpec((1, bn), lambda i, j: (0, j)),
            ],
            out_specs=pl.BlockSpec((tb, bn), lambda i, j: (i, j)),
            scratch_shapes=[pltpu.VMEM((tb, hidden_p), w_dtype)],
        ),
        compiler_params=pltpu.CompilerParams(
            dimension_semantics=("parallel", "arbitrary"),
            vmem_limit_bytes=vmem_limit),
        cost_estimate=cost,
    )(x, w1t, b1_2d, w2t, b2_2d)


def reference_forward(x, w1, b1, w2, b2):
    h = jax.nn.sigmoid(x @ w1.T + b1)
    return h @ w2.T + b2


if __name__ == "__main__":
    # Small config consistent with AutoRec: config['num_items'], config['hidden_units'].
    num_items = 256      # catalog size
    hidden_units = 100   # deliberately NOT 128-aligned -> exercises hidden padding
    batch = 37           # deliberately NOT a multiple of the tile -> partial last block

    key = jax.random.PRNGKey(0)
    kx, kw1, kb1, kw2, kb2 = jax.random.split(key, 5)

    # PyTorch Linear shapes: weights are [out, in].
    x = jax.random.normal(kx, (batch, num_items), dtype=jnp.float32)
    w1 = jax.random.normal(kw1, (hidden_units, num_items), dtype=jnp.float32) * 0.05
    b1 = jax.random.normal(kb1, (hidden_units,), dtype=jnp.float32) * 0.05
    w2 = jax.random.normal(kw2, (num_items, hidden_units), dtype=jnp.float32) * 0.05
    b2 = jax.random.normal(kb2, (num_items,), dtype=jnp.float32) * 0.05

    # One-time parameter prep (transpose + bf16 cast + pad hidden 100 -> 128).
    w1t, b1_2d, w2t, b2_2d = prepare_autorec_params(w1, b1, w2, b2)

    ref = reference_forward(x, w1, b1, w2, b2)

    # Path A: resident-weight kernel.  Small block_batch only so the tiny demo batch
    # yields a multi-step grid; real workloads keep the default 128 (or 256 on v6e/v7x).
    out_a = autorec_forward(x, w1t, b1_2d, w2t, b2_2d,
                            block_batch=16, out_dtype=jnp.float32)
    out_a = jax.block_until_ready(out_a)
    assert out_a.shape == (batch, num_items)
    assert jnp.allclose(out_a, ref, atol=3e-2, rtol=3e-2), "resident path mismatch"

    # Path B: decoder N-tiled kernel (the large-catalog / v7x layout), forced at small
    # shapes so it is exercised and checked too.
    out_b = autorec_forward(x, w1t, b1_2d, w2t, b2_2d,
                            block_batch=16, block_n=128,
                            out_dtype=jnp.float32, force_tiled=True)
    out_b = jax.block_until_ready(out_b)
    assert out_b.shape == (batch, num_items)
    assert jnp.allclose(out_b, ref, atol=3e-2, rtol=3e-2), "tiled path mismatch"

    print("KERNEL_OK")
</pallas_src>

<mosaic_0001>
module attributes {stable_mosaic.version = 11 : i64} {
  func.func @_autorec_resident_kernel(%arg0: i32, %arg1: memref<16x256xf32, #tpu.memory_space<vmem>>, %arg2: memref<256x128xbf16, #tpu.memory_space<vmem>>, %arg3: memref<1x128xf32, #tpu.memory_space<vmem>>, %arg4: memref<128x256xbf16, #tpu.memory_space<vmem>>, %arg5: memref<1x256xf32, #tpu.memory_space<vmem>>, %arg6: memref<16x256xf32, #tpu.memory_space<vmem>>) attributes {dimension_semantics = [#tpu.dimension_semantics<parallel>], iteration_bounds = array<i64: 3>, scalar_prefetch = 0 : i64, scratch_operands = 0 : i64, tpu.core_type = #tpu.core_type<tc>, window_params = [{transform_indices = @transform_0, window_bounds = array<i64: 16, 256>}, {pipeline_mode = #tpu.pipeline_mode<synchronous>, transform_indices = @transform_1, window_bounds = array<i64: 256, 128>}, {pipeline_mode = #tpu.pipeline_mode<synchronous>, transform_indices = @transform_2, window_bounds = array<i64: 1, 128>}, {pipeline_mode = #tpu.pipeline_mode<synchronous>, transform_indices = @transform_3, window_bounds = array<i64: 128, 256>}, {pipeline_mode = #tpu.pipeline_mode<synchronous>, transform_indices = @transform_4, window_bounds = array<i64: 1, 256>}, {transform_indices = @transform_5, window_bounds = array<i64: 16, 256>}]} {
    %c0 = arith.constant 0 : index
    %c0_0 = arith.constant 0 : index
    %0 = vector.load %arg1[%c0, %c0_0] : memref<16x256xf32, #tpu.memory_space<vmem>>, vector<16x256xf32>
    %1 = arith.truncf %0 : vector<16x256xf32> to vector<16x256xbf16>
    %c0_1 = arith.constant 0 : index
    %c0_2 = arith.constant 0 : index
    %2 = vector.load %arg2[%c0_1, %c0_2] : memref<256x128xbf16, #tpu.memory_space<vmem>>, vector<256x128xbf16>
    %cst = arith.constant dense<0.000000e+00> : vector<16x128xf32>
    %3 = tpu.matmul %1, %2, %cst {dimension_numbers = #tpu.dot_dimension_numbers<[1], [0], [0], [1], [0, 0, 1, 1], [], []>} : vector<16x256xbf16>, vector<256x128xbf16>, vector<16x128xf32> -> vector<16x128xf32>
    %c0_3 = arith.constant 0 : index
    %c0_4 = arith.constant 0 : index
    %4 = vector.load %arg3[%c0_3, %c0_4] : memref<1x128xf32, #tpu.memory_space<vmem>>, vector<1x128xf32>
    %5 = vector.broadcast %4 : vector<1x128xf32> to vector<16x128xf32>
    %6 = arith.addf %3, %5 : vector<16x128xf32>
    %7 = arith.negf %6 : vector<16x128xf32>
    %8 = math.exp %7 : vector<16x128xf32>
    %cst_5 = arith.constant 1.000000e+00 : f32
    %9 = vector.broadcast %cst_5 : f32 to vector<16x128xf32>
    %10 = arith.addf %9, %8 : vector<16x128xf32>
    %11 = arith.divf %9, %10 : vector<16x128xf32>
    %12 = arith.truncf %11 : vector<16x128xf32> to vector<16x128xbf16>
    %c0_6 = arith.constant 0 : index
    %c0_7 = arith.constant 0 : index
    %13 = vector.load %arg4[%c0_6, %c0_7] : memref<128x256xbf16, #tpu.memory_space<vmem>>, vector<128x256xbf16>
    %cst_8 = arith.constant dense<0.000000e+00> : vector<16x256xf32>
    %14 = tpu.matmul %12, %13, %cst_8 {dimension_numbers = #tpu.dot_dimension_numbers<[1], [0], [0], [1], [0, 0, 1, 1], [], []>} : vector<16x128xbf16>, vector<128x256xbf16>, vector<16x256xf32> -> vector<16x256xf32>
    %c0_9 = arith.constant 0 : index
    %c0_10 = arith.constant 0 : index
    %15 = vector.load %arg5[%c0_9, %c0_10] : memref<1x256xf32, #tpu.memory_space<vmem>>, vector<1x256xf32>
    %16 = vector.broadcast %15 : vector<1x256xf32> to vector<16x256xf32>
    %17 = arith.addf %14, %16 : vector<16x256xf32>
    %c0_11 = arith.constant 0 : index
    %c0_12 = arith.constant 0 : index
    %18 = vector.load %arg6[%c0_11, %c0_12] : memref<16x256xf32, #tpu.memory_space<vmem>>, vector<16x256xf32>
    tpu.vector_store %arg6[%c0_11, %c0_12], %17 {strides = array<i32>} : memref<16x256xf32, #tpu.memory_space<vmem>>, vector<16x256xf32>,
    return
  }
  func.func @transform_0(%arg0: i32) -> (i32, i32) {
    %c0_i32 = arith.constant 0 : i32
    %c0_i32_0 = arith.constant 0 : i32
    return %arg0, %c0_i32 : i32, i32
  }
  func.func @transform_1(%arg0: i32) -> (i32, i32) {
    %c0_i32 = arith.constant 0 : i32
    %c0_i32_0 = arith.constant 0 : i32
    %c0_i32_1 = arith.constant 0 : i32
    return %c0_i32, %c0_i32_0 : i32, i32
  }
  func.func @transform_2(%arg0: i32) -> (i32, i32) {
    %c0_i32 = arith.constant 0 : i32
    %c0_i32_0 = arith.constant 0 : i32
    %c0_i32_1 = arith.constant 0 : i32
    return %c0_i32, %c0_i32_0 : i32, i32
  }
  func.func @transform_3(%arg0: i32) -> (i32, i32) {
    %c0_i32 = arith.constant 0 : i32
    %c0_i32_0 = arith.constant 0 : i32
    %c0_i32_1 = arith.constant 0 : i32
    return %c0_i32, %c0_i32_0 : i32, i32
  }
  func.func @transform_4(%arg0: i32) -> (i32, i32) {
    %c0_i32 = arith.constant 0 : i32
    %c0_i32_0 = arith.constant 0 : i32
    %c0_i32_1 = arith.constant 0 : i32
    return %c0_i32, %c0_i32_0 : i32, i32
  }
  func.func @transform_5(%arg0: i32) -> (i32, i32) {
    %c0_i32 = arith.constant 0 : i32
    %c0_i32_0 = arith.constant 0 : i32
    return %arg0, %c0_i32 : i32, i32
  }
}

</mosaic_0001>

<bundles_post_ra>
// kernel: autorec_forward.1
= control target key start
LH: loop header
LB: loop body
LE: loop exit
PB: predicated region body
PF: predicated region fallthrough
CT: control target
= control target key end

     0   :  { %10 = vsyncpa [#allocation3], 0  ;;  %s1383_s0 = inlined_call_operand.hbm [shape: f32[37,256], index: 0, kind: input, shape index: {}]   ;;  %s1384_s1 = inlined_call_operand.hbm [shape: bf16[256,128], index: 1, kind: input, shape index: {}]   ;;  %s1385_s2 = inlined_call_operand.vmem [shape: f32[1,128], index: 2, kind: input, shape index: {}]   ;;  %s1386_s3 = inlined_call_operand.hbm [shape: bf16[128,256], index: 3, kind: input, shape index: {}]   ;;  %s1387_s4 = inlined_call_operand.vmem [shape: f32[1,256], index: 4, kind: input, shape index: {}]   ;;  %s1388_s5 = inlined_call_operand.hbm [shape: f32[37,256], index: 5, kind: output, shape index: {}]  }
   0x1   :  { %12 = vsyncpa [#allocation3 + $0x1], 0 }
   0x2   :  { %13 = vsyncpa [#allocation6], 0 }
   0x3   :  { %14 = vsyncpa [#allocation4], 0 }
   0x4   :  { %16 = vsyncpa [#allocation4 + $0x1], 0  ;;  %s1158_s18 = smov 0   ;;  %s1160_s19 = smov 0  }
   0x5   :  { %s1162_s20 = smov 0   ;;  %s1164_s21 = smov 0  }
   0x6 LB: > { %s1179_s22 = sadd.s32 4294967295, %s1113_s21   ;;  %s757_s23 = sadd.s32 4294967294, %s1113_s21   ;;  %s1113_s21 = sphi %s1164_s21, %s1405_s21   ;;  %s1109_s20 = sphi %s1162_s20, %s1404_s20   ;;  %s1105_s19 = sphi %s1160_s19, %s1403_s19   ;;  %s1101_s18 = sphi %s1158_s18, %s1402_s18  }
   0x7   : > { %s1183_s24 = sadd.s32 1, %s1113_s21   ;;  %s29_s25 = sadd.s32 1, %s1109_s20 }
   0x8   : > { %s26_s26 = ssub.s32 %s1113_s21, %s1183_s24  ;;  %p36_p0 = scmp.ne.s32.totalorder %s1109_s20, %s1105_s19 }
   0x9   : > { %p27_p1 = scmp.eq.s32.totalorder %s26_s26, 0  ;;  %p37_p2 = scmp.eq.s32.totalorder %s1113_s21, 0 }
   0xa   : > { %p42_p3 = scmp.ne.s32.totalorder %s1105_s19, %s1101_s18  ;;  %p1389_p4 = scmp.eq.s32.totalorder %s1179_s22, 0 }
   0xb   : > { %s1195_s27 = scalar_select %p27_p1, %s1109_s20, %s29_s25  }
   0xc   : > { %p1197_p5 = por %p37_p2, %p36_p0  ;;  %p1203_p6 = por %p1389_p4, %p42_p3 }
   0xd   : > { %p150_p7 = scmp.eq.s32.totalorder %s1179_s22, 2  ;;  %p156_p8 = scmp.eq.s32.totalorder %s757_s23, 2 }
   0xe   : > { %s1392_s29 = scalar_select %p1203_p6, 1, 0 }
   0xf   : > { %p758_p9 = scmp.ge.s32.totalorder %s1113_s21, 1  ;;  %p163_p10 = scmp.lt.s32.totalorder %s1113_s21, 4 }
  0x10   : > { %p1210_p11 = por %p150_p7, %p36_p0  ;;  %p1214_p12 = por %p156_p8, %p42_p3 }
  0x11   : > { %p1218_p13 = pnand %p758_p9, %p163_p10  ;;  %s1115_s8 = smov [#allocation5]  }
  0x12   : > { %s1393_s30 = scalar_select %p1210_p11, 1, 0 }
  0x13   : > { %s1394_s6 = scalar_select %p1214_p12, 1, 0 }
  0x14   : > { %p860_p1 = pneg %p1218_p13  ;;  %s175_s9 = sshll.u32 %s1115_s8, 4  ;;  %s176_s9 = int_to_ptr.vmem [resolvable:$true] %s175_s9 }
  0x15   : > { %s1116_s11 = smov [#allocation7]   ;;  %s978_s13 = scalar_lea.vmem %s176_s9, 2048 }
  0x16   : > { %p1226_p2 = pnand %p860_p1, %p1389_p4  ;;  %s191_s12 = sshll.u32 %s1116_s11, 4  ;;  %s192_s12 = int_to_ptr.vmem [resolvable:$true] %s191_s12 }
  0x17   : > { %p979_p3 = scmp.ne.s32.totalorder %s176_s9, %s978_s13  ;;  %p986_p9 = scmp.lt.s32.totalorder %s176_s9, %s176_s9 }
  0x18   : > { %p969_p0 = pneg %p1226_p2  ;;  %p987_p10 = scmp.lt.s32.totalorder %s978_s13, %s978_s13 }
  0x1a   : > { %p981_p7 = pnand %p979_p3, %p969_p0  ;;  %p988_p12 = por %p987_p10, %p986_p9 }
  0x1c   : > { %p982_p8 = pneg %p981_p7 }
  0x1e   : > { %p989_p1 = pnand %p988_p12, %p982_p8 }
  0x20   : > { %992 = shalt.err (!%p989_p1)
}
  0x21   : > { %s1117_s14 = smov 64   ;;  %s1118_s15 = smov 4  }
  0x22   : > { %863 = dma.hbm_to_vmem [thread:$0]  (!%p1226_p2), %s1384_s1, 2048, %s176_s9, [#allocation6], %s1117_s14, %s1117_s14, %s1118_s15  }
  0x23   : > { %s1004_s23 = scalar_lea.vmem %s192_s12, 2048  ;;  %p1012_p11 = scmp.lt.s32.totalorder %s192_s12, %s192_s12 }
  0x24   : > { %p1005_p4 = scmp.ne.s32.totalorder %s192_s12, %s1004_s23  ;;  %p1013_p6 = scmp.lt.s32.totalorder %s1004_s23, %s1004_s23 }
  0x26   : > { %p1007_p3 = pnand %p1005_p4, %p969_p0  ;;  %p1014_p9 = por %p1013_p6, %p1012_p11 }
  0x28   : > { %p1008_p7 = pneg %p1007_p3 }
  0x2a   : > { %p1015_p12 = pnand %p1014_p9, %p1008_p7 }
  0x2c   : > { %1018 = shalt.err (!%p1015_p12)
}
  0x2d   : > { %s1119_s25 = smov 128   ;;  %s1120_s26 = smov 8  }
  0x2e   : > { %866 = dma.hbm_to_vmem [thread:$0]  (!%p1226_p2), %s1386_s3, 2048, %s192_s12, [#allocation6], %s1119_s25, %s1119_s25, %s1120_s26  }
  0x2f   : > { %p761_p8 = scmp.ge.s32.totalorder %s1113_s21, 3 }
  0x31   : > { %204 = sbr.rel (%p761_p8) target bundleno = 86 (0x56), region = 32 }
  0x36   : > { %207 = sbr.rel (!%p1197_p5) target bundleno = 86 (0x56), region = 36  ;;  %s208_s9 = sand.u32 (%p1197_p5), 1, %s1109_s20  }
  0x37   : > { %s763_s13 = sshll.u32 (%p1197_p5), %s1113_s21, 1  ;;  %s762_s14 = sshll.u32 (%p1197_p5), %s208_s9, 5 }
  0x38   : > { %s214_s15 = ssub.s32 (%p1197_p5), 5, %s763_s13  ;;  %s1256_s17 = scalar_lea.sflag (%p1197_p5), [#allocation3], %s208_s9 }
  0x39   : > { %p215_p4 = scmp.lt.s32.totalorder (%p1197_p5), %s214_s15, 2  ;;  %s212_s12 = scalar_lea.vmem (%p1197_p5), [#allocation2], %s762_s14 }
  0x3b   : > { %s1407_s15 = smov (!%p215_p4, %s214_s15), 2 }
  0x3c   : > { %s1253_s16 = sshll.u32 %s1407_s15, 8 }
  0x3d   : > { %s220_s10 = ssub.s32 512, %s1253_s16 }
  0x3e   : > { %221 = vsyncadd %s1256_s17, %s220_s10  ;;  %p766_p5 = scmp.ne.s32.totalorder %s1253_s16, 0  ;;  %s824_s28 = sshll.u32 %s1113_s21, 9 }
  0x3f   : > { %s1264_s26 = scalar_lea.hbm %s1383_s0, %s824_s28  ;;  %s227_s8 = sshll.u32 %s212_s12, 4  ;;  %s1266_s8 = int_to_ptr.vmem [resolvable:$true] %s227_s8 }
  0x40   : > { %s1019_s11 = scalar_lea.hbm %s1264_s26, %s1253_s16  ;;  %s1023_s14 = scalar_lea.hbm %s1383_s0, 1280 }
  0x41   : > { %p1020_p6 = scmp.ne.s32.totalorder %s1264_s26, %s1019_s11  ;;  %p1024_p0 = scmp.lt.s32.totalorder %s1264_s26, %s1383_s0 }
  0x42   : > { %p1025_p10 = scmp.lt.s32.totalorder %s1023_s14, %s1019_s11 }
  0x43   : > { %p1021_p11 = pnand %p1020_p6, %p766_p5 }
  0x44   : > { %p1026_p1 = por %p1025_p10, %p1024_p0 }
  0x45   : > { %p1022_p2 = pneg %p1021_p11 }
  0x47   : > { %p1027_p3 = pnand %p1026_p1, %p1022_p2 }
  0x49   : > { %1030 = shalt.err (!%p1027_p3)
}
  0x4a   : > { %s1031_s12 = scalar_lea.vmem %s1266_s8, %s1253_s16  ;;  %s1121_s28 = smov [#allocation2]  }
  0x4b   : > { %p1032_p7 = scmp.ne.s32.totalorder %s1266_s8, %s1031_s12  ;;  %s1035_s23 = sshll.u32 %s1121_s28, 4  ;;  %s1036_s23 = int_to_ptr.vmem [resolvable:$false] %s1035_s23 }
  0x4c   : > { %s1037_s25 = scalar_lea.vmem %s1036_s23, 1024  ;;  %p1038_p8 = scmp.lt.s32.totalorder %s1266_s8, %s1036_s23 }
  0x4d   : > { %p1033_p9 = pnand %p1032_p7, %p766_p5  ;;  %p1039_p4 = scmp.lt.s32.totalorder %s1037_s25, %s1031_s12 }
  0x4f   : > { %p1034_p12 = pneg %p1033_p9  ;;  %p1040_p6 = por %p1039_p4, %p1038_p8 }
  0x51   : > { %p1041_p11 = pnand %p1040_p6, %p1034_p12 }
  0x53   : > { %1044 = shalt.err (!%p1041_p11)
}
  0x54   : > { %s1122_s11 = smov 256   ;;  %s1123_s9 = smov 16  }
  0x55   : > { %233 = dma.hbm_to_vmem [thread:$0]  (%p766_p5), %s1264_s26, %s1253_s16, %s1266_s8, %s1256_s17, %s1122_s11, %s1122_s11, %s1123_s9  }
  0x56 PF: > { %239 = sbr.rel (%p1218_p13) target bundleno = 594 (0x252), region = 40  ;;  %s1295_s13 = sand.u32 (!%p1218_p13), 1, %s1105_s19  }
  0x57   : > { %s772_s14 = sshll.u32 (!%p1218_p13), %s1295_s13, 5  ;;  %s242_s15 = scalar_lea.sflag (!%p1218_p13), [#allocation3], %s1295_s13 }
  0x58   : > { %s1301_s10 = scalar_lea.vmem (!%p1218_p13), [#allocation2], %s772_s14  ;;  %p1397_p2 = scmp.ne.s32.totalorder (!%p1218_p13), %s1392_s29, 0 }
  0x5b   : > { %1088 = dma.done.wait (%p1397_p2), %s242_s15, 512  }
  0x5c   : > { %1090 = vsyncadd (%p1397_p2), %s242_s15, 4294966784  ;;  %p1398_p5 = scmp.eq.s32.totalorder %s1179_s22, 0 }
  0x5e   : > { %1092 = dma.done.wait (%p1398_p5), [#allocation6], 4096   ;;  %p1399_p13 = pmov %p1398_p5 }
  0x5f   : > { %v919_v0 = vld [vmem:[#allocation5 + $0x78] sm:$0xff]   ;;  %v921_v2 = vld [vmem:[#allocation5 + $0x70] sm:$0xff]   ;;  %v923_v4 = vld [vmem:[#allocation5 + $0x68] sm:$0xff]   ;;  %v1124_v35 = vmov 0   ;;  %v506_v57 = vlaneseq  ;;  %s279_s26 = scalar_lea.vmem [#allocation8], %s772_s14  ;;  %s644_s8 = scalar_lea.sflag [#allocation4], %s1295_s13 }
  0x60   : > { %1094 = vsyncadd (%p1399_p13), [#allocation6], 4294963200  ;;  %v920_v1 = vld [vmem:[#allocation5 + $0x38] sm:$0xff]   ;;  %828 = vmatprep.subr.bf16.mxu0 %v919_v0  ;;  %v922_v3 = vld [vmem:[#allocation5 + $0x30] sm:$0xff]   ;;  %628 = vmatprep.mubr.bf16.mxu1 %v1124_v35  ;;  %p1400_p0 = scmp.ne.s32.totalorder %s1393_s30, 0 }
  0x61   : > { %829 = vmatpush3.bf16.msra.mxu0 %v920_v1  ;;  %v924_v5 = vld [vmem:[#allocation5 + $0x28] sm:$0xff]   ;;  %v925_v6 = vld [vmem:[#allocation5 + $0x60] sm:$0xff]   ;;  %v927_v8 = vld [vmem:[#allocation5 + $0x58] sm:$0xff]   ;;  %v507_v58 = vshrl.u32 %v506_v57, 7  ;;  %s812_s12 = sshll.u32 (%p1400_p0), %s1179_s22, 1 }
  0x62   : > { %830 = vmatprep.subr.bf16.mxu0 %v921_v2  ;;  %v926_v7 = vld [vmem:[#allocation5 + $0x20] sm:$0xff]   ;;  %v928_v9 = vld [vmem:[#allocation5 + $0x18] sm:$0xff]   ;;  %v929_v10 = vld [vmem:[#allocation5 + $0x50] sm:$0xff]   ;;  %s652_s28 = ssub.s32 (%p1400_p0), 5, %s812_s12 }
  0x63   : > { %v294_v11 = vld [vmem:[%s1301_s10 + $0x8] sm:$0xff]  ;;  %v296_v12 = vld [vmem:[%s1301_s10 + $0x18] sm:$0xff]  ;;  %v930_v13 = vld [vmem:[#allocation5 + $0x10] sm:$0xff]   ;;  %v508_v59 = vsub.s32 0, %v507_v58  ;;  %v512_v61 = vsub.s32 1, %v507_v58  ;;  %p653_p10 = scmp.lt.s32.totalorder (%p1400_p0), %s652_s28, 2 }
  0x64   : > { %v298_v14 = vpack.c.bf16 %v296_v12, %v294_v11  ;;  %v931_v15 = vld [vmem:[#allocation5 + $0x48] sm:$0xff]   ;;  %v933_v17 = vld [vmem:[#allocation5 + $0x40] sm:$0xff]   ;;  %v295_v20 = vld [vmem:[%s1301_s10 + $0x10] sm:$0xff] }
  0x65   : > { %831 = vmatpush3.bf16.msra.mxu0 %v922_v3  ;;  %v932_v16 = vld [vmem:[#allocation5 + $0x8] sm:$0xff]   ;;  %v934_v18 = vld [vmem:[#allocation5] sm:$0xff]   ;;  %v935_v22 = vld [vmem:[#allocation7 + $0x74] ss:$8 sps:$4 sm:$0xff]  }
  0x66   : > { %832 = vmatprep.subr.bf16.mxu0 %v923_v4  ;;  %466 = vmatprep.mubr.bf16.mxu0 %v298_v14  ;;  %v293_v19 = vld [vmem:[%s1301_s10] sm:$0xff]  ;;  %v937_v23 = vld [vmem:[#allocation7 + $0x70] ss:$8 sps:$4 sm:$0xff]   ;;  %v941_v26 = vld [vmem:[#allocation7 + $0x54] ss:$8 sps:$4 sm:$0xff]  }
  0x67   : > { %v297_v21 = vpack.c.bf16 %v295_v20, %v293_v19  ;;  %596 = vmatprep.subr.bf16.mxu1 %v935_v22  ;;  %v938_v24 = vld [vmem:[#allocation7 + $0x64] ss:$8 sps:$4 sm:$0xff]   ;;  %v940_v25 = vld [vmem:[#allocation7 + $0x60] ss:$8 sps:$4 sm:$0xff]   ;;  %v943_v27 = vld [vmem:[#allocation7 + $0x50] ss:$8 sps:$4 sm:$0xff]  }
  0x68   : > { %597 = vmatpush1.bf16.msra.mxu1 %v937_v23  ;;  %v944_v28 = vld [vmem:[#allocation7 + $0x44] ss:$8 sps:$4 sm:$0xff]   ;;  %v946_v29 = vld [vmem:[#allocation7 + $0x40] ss:$8 sps:$4 sm:$0xff]   ;;  %v947_v30 = vld [vmem:[#allocation7 + $0x34] ss:$8 sps:$4 sm:$0xff]  }
  0x69   : > { %833 = vmatpush3.bf16.msra.mxu0 %v924_v5  ;;  %598 = vmatprep.subr.bf16.mxu1 %v938_v24  ;;  %v949_v31 = vld [vmem:[#allocation7 + $0x30] ss:$8 sps:$4 sm:$0xff]   ;;  %v950_v32 = vld [vmem:[#allocation7 + $0x24] ss:$8 sps:$4 sm:$0xff]   ;;  %v952_v33 = vld [vmem:[#allocation7 + $0x20] ss:$8 sps:$4 sm:$0xff]  }
  0x6a   : > { %834 = vmatprep.subr.bf16.mxu0 %v925_v6  ;;  %v953_v34 = vld [vmem:[#allocation7 + $0x14] ss:$8 sps:$4 sm:$0xff]   ;;  %v955_v36 = vld [vmem:[#allocation7 + $0x10] ss:$8 sps:$4 sm:$0xff]   ;;  %v956_v37 = vld [vmem:[#allocation7 + $0x4] ss:$8 sps:$4 sm:$0xff]  }
  0x6b   : > { %v958_v38 = vld [vmem:[#allocation7] ss:$8 sps:$4 sm:$0xff]  }
  0x6c   : > { %599 = vmatpush1.bf16.msra.mxu1 %v940_v25  ;;  %v776_v40 = vld [vmem:[%s1385_s2] ss:$0 sm:$0xff] }
  0x6d   : > { %835 = vmatpush3.bf16.msra.mxu0 %v926_v7  ;;  %600 = vmatprep.subr.bf16.mxu1 %v941_v26  ;;  %v504_v60 = vld [vmem:[%s1387_s4] sm:$0x3] }
  0x6e   : > { %836 = vmatprep.subr.bf16.mxu0 %v927_v8  ;;  %v509_v62 = vrot.slane %v504_v60, %v508_v59  ;;  %v513_v63 = vrot.slane %v504_v60, %v512_v61 }
  0x70   : > { %601 = vmatpush1.bf16.msra.mxu1 %v943_v27 }
  0x71   : > { %837 = vmatpush3.bf16.msra.mxu0 %v928_v9  ;;  %602 = vmatprep.subr.bf16.mxu1 %v944_v28 }
  0x72   : > { %838 = vmatprep.subr.bf16.mxu0 %v929_v10 }
  0x74   : > { %603 = vmatpush1.bf16.msra.mxu1 %v946_v29 }
  0x75   : > { %839 = vmatpush3.bf16.msra.mxu0 %v930_v13  ;;  %604 = vmatprep.subr.bf16.mxu1 %v947_v30 }
  0x76   : > { %840 = vmatprep.subr.bf16.mxu0 %v931_v15 }
  0x78   : > { %605 = vmatpush1.bf16.msra.mxu1 %v949_v31 }
  0x79   : > { %841 = vmatpush3.bf16.msra.mxu0 %v932_v16  ;;  %606 = vmatprep.subr.bf16.mxu1 %v950_v32 }
  0x7a   : > { %842 = vmatprep.subr.bf16.mxu0 %v933_v17 }
  0x7c   : > { %607 = vmatpush1.bf16.msra.mxu1 %v952_v33 }
  0x7d   : > { %843 = vmatpush3.bf16.msra.mxu0 %v934_v18  ;;  %608 = vmatprep.subr.bf16.mxu1 %v953_v34 }
  0x80   : > { %467 = vmatmul.mubr.bf16.vlgmr.msra.gmra.mxu0 %v297_v21  ;;  %609 = vmatpush1.bf16.msra.mxu1 %v955_v36 }
  0x81   : > { %610 = vmatprep.subr.bf16.mxu1 %v956_v37 }
  0x84   : > { %611 = vmatpush1.bf16.msra.mxu1 %v958_v38 }
 0x140   : > { %v844_v39 = vpop.f32.mrf.mxu0 }
 0x142   : > { %v845_v41 = vpop.f32.mrf.mxu0 }
 0x143   : > { %v846_v42 = vadd.f32 %v845_v41, %v844_v39 }
 0x144   : > { %v847_v43 = vpop.f32.mrf.mxu0 }
 0x145   : > { %v469_v44 = vadd.f32 %v846_v42, %v776_v40 }
 0x146   : > { %v848_v45 = vpop.f32.mrf.mxu0 }
 0x147   : > { %v793_v46 = vmul.f32 -1.442695, %v469_v44  ;;  %v849_v47 = vadd.f32 %v848_v45, %v847_v43 }
 0x149   : > { %959 = vpow2.f32 %v793_v46  ;;  %v472_v48 = vadd.f32 %v849_v47, %v776_v40 }
 0x14b   : > { %v794_v49 = vmul.f32 -1.442695, %v472_v48 }
 0x14d   : > { %961 = vpow2.f32 %v794_v49 }
 0x156   : > { %v960_v50 = vpop.eup %959 }
 0x157   : > { %v481_v51 = vadd.f32 1.0, %v960_v50 }
 0x159   : > { %963 = vrcp.f32 %v481_v51 }
 0x15a   : > { %v962_v52 = vpop.eup %961 }
 0x15b   : > { %v482_v53 = vadd.f32 1.0, %v962_v52 }
 0x15d   : > { %965 = vrcp.f32 %v482_v53 }
 0x166   : > { %v964_v54 = vpop.eup %963 }
 0x16a   : > { %v966_v55 = vpop.eup %965 }
 0x16b   : > { %v487_v56 = vpack.c.bf16 %v966_v55, %v964_v54 }
 0x16d   : > { %629 = vmatmul.mubr.bf16.vlgmr.msra.gmra.mxu1 %v487_v56 }
 0x22d   : > { %v630_v0 = vpop.f32.mrf.mxu1 }
 0x22e   : > { %v631_v1 = vadd.f32 %v630_v0, %v509_v62 }
 0x22f   : > { %v632_v2 = vpop.f32.mrf.mxu1 }
 0x230   : > { %639 = vst [vmem:[%s279_s26] sm:$0xff] %v631_v1  ;;  %v633_v3 = vadd.f32 %v632_v2, %v513_v63 }
 0x231   : > { %v634_v4 = vpop.f32.mrf.mxu1 }
 0x232   : > { %640 = vst [vmem:[%s279_s26 + $0x8] sm:$0xff] %v633_v3  ;;  %v635_v5 = vadd.f32 %v634_v4, %v509_v62  ;;  %650 = sbr.rel (!%p1400_p0) target bundleno = 594 (0x252), region = 56 }
 0x233   : > { %v636_v6 = vpop.f32.mrf.mxu1 }
 0x234   : > { %641 = vst [vmem:[%s279_s26 + $0x10] sm:$0xff] %v635_v5  ;;  %v637_v7 = vadd.f32 %v636_v6, %v513_v63 }
 0x236   : > { %642 = vst [vmem:[%s279_s26 + $0x18] sm:$0xff] %v637_v7 }
 0x237   : > { %s1409_s28 = smov (!%p653_p10, %s652_s28), 2 }
 0x238   : > { %s1327_s23 = sshll.u32 %s1409_s28, 8 }
 0x239   : > { %s658_s25 = ssub.s32 512, %s1327_s23 }
 0x23a   : > { %659 = vsyncadd %s644_s8, %s658_s25  ;;  %p815_p1 = scmp.ne.s32.totalorder %s1327_s23, 0  ;;  %s827_s11 = sshll.u32 %s1179_s22, 9 }
 0x23b   : > { %s1337_s14 = scalar_lea.hbm %s1388_s5, %s827_s11  ;;  %s665_s15 = sshll.u32 %s279_s26, 4  ;;  %s1339_s15 = int_to_ptr.vmem [resolvable:$true] %s665_s15 }
 0x23c   : > { %s1045_s10 = scalar_lea.vmem %s1339_s15, %s1327_s23  ;;  %s1125_s29 = smov [#allocation8]  }
 0x23d   : > { %p1046_p3 = scmp.ne.s32.totalorder %s1339_s15, %s1045_s10  ;;  %s1049_s7 = sshll.u32 %s1125_s29, 4  ;;  %s1050_s7 = int_to_ptr.vmem [resolvable:$false] %s1049_s7 }
 0x23e   : > { %s1051_s22 = scalar_lea.vmem %s1050_s7, 1024  ;;  %p1052_p12 = scmp.lt.s32.totalorder %s1339_s15, %s1050_s7 }
 0x23f   : > { %p1047_p7 = pnand %p1046_p3, %p815_p1  ;;  %p1053_p8 = scmp.lt.s32.totalorder %s1051_s22, %s1045_s10 }
 0x241   : > { %p1048_p9 = pneg %p1047_p7  ;;  %p1054_p4 = por %p1053_p8, %p1052_p12 }
 0x243   : > { %p1055_p6 = pnand %p1054_p4, %p1048_p9 }
 0x245   : > { %1058 = shalt.err (!%p1055_p6)
}
 0x246   : > { %s1059_s16 = scalar_lea.hbm %s1337_s14, %s1327_s23  ;;  %s1063_s12 = scalar_lea.hbm %s1388_s5, 1280 }
 0x247   : > { %p1060_p11 = scmp.ne.s32.totalorder %s1337_s14, %s1059_s16  ;;  %p1064_p13 = scmp.lt.s32.totalorder %s1337_s14, %s1388_s5 }
 0x248   : > { %p1065_p0 = scmp.lt.s32.totalorder %s1063_s12, %s1059_s16 }
 0x249   : > { %p1061_p2 = pnand %p1060_p11, %p815_p1 }
 0x24a   : > { %p1066_p10 = por %p1065_p0, %p1064_p13 }
 0x24b   : > { %p1062_p5 = pneg %p1061_p2 }
 0x24d   : > { %p1067_p3 = pnand %p1066_p10, %p1062_p5 }
 0x24f   : > { %1070 = shalt.err (!%p1067_p3)
}
 0x250   : > { %s1126_s11 = smov 256   ;;  %s1127_s30 = smov 16  }
 0x251   : > { %671 = dma.vmem_to_hbm [thread:$0]  (%p815_p1), %s1339_s15, %s1327_s23, %s1337_s14, %s644_s8, %s1126_s11, %s1126_s11, %s1127_s30  }
 0x252 PF: > { %p875_p7 = scmp.ge.s32.totalorder %s1113_s21, 2  ;;  %s680_s9 = sand.u32 1, %s1101_s18  }
 0x253   : > { %p1401_p9 = scmp.ne.s32.totalorder %s1394_s6, 0  ;;  %s681_s10 = scalar_lea.sflag [#allocation4], %s680_s9 }
 0x255   : > { %p868_p12 = pnand %p875_p7, %p1401_p9 }
 0x257   : > { %p869_p8 = pneg %p868_p12 }
 0x259   : > { %1096 = dma.done.wait (%p869_p8), %s681_s10, 512  }
 0x25a   : > { %1098 = vsyncadd (%p869_p8), %s681_s10, 4294966784  ;;  %p19_p4 = scmp.ge.s32.totalorder %s1183_s24, 5   ;;  %s1402_s18 = smov %s1105_s19 }
 0x25b   : > { %s1403_s19 = smov %s1109_s20  ;;  %s1404_s20 = smov %s1195_s27 }
 0x25c   : > { %s1405_s21 = smov %s1183_s24  ;;  %21 = sbr.rel (!%p19_p4) target bundleno = 6 (0x6), region = 93 }
 0x261   :  { %686 = vsyncpa [#allocation3], 1 }
 0x262   :  { %688 = vsyncpa [#allocation3 + $0x1], 1 }
 0x263   :  { %689 = vsyncpa [#allocation6], 1 }
 0x264   :  { %690 = vsyncpa [#allocation4], 1 }
 0x265   :  { %692 = vsyncpa [#allocation4 + $0x1], 1 }

</bundles_post_ra>
